<compile_context>
chip_gen: v7x
topology: tpu7x:2x2x1
jax: 0.10.0
libtpu: 0.0.40
codegen_flags: <defaults>
</compile_context>

<pallas_src>
import functools

import jax
import jax.numpy as jnp
from jax.experimental import pallas as pl
from jax.experimental.pallas import tpu as pltpu

LANE = 128          # TPU lane width (last-dim granule)
SUBLANE_BF16 = 16   # bf16 sublane packing height


def _round_up(x, m):
    return ((x + m - 1) // m) * m


def _actor_logp_kernel(x_ref, w1_ref, b1_ref, w2_ref, b2_ref, logp_ref):
    # Linear 1 (bf16 MXU operands, f32 accumulation) + bias + ReLU in f32.
    x = x_ref[...].astype(jnp.bfloat16)                       # (TB, L1)
    h = jnp.dot(x, w1_ref[...], preferred_element_type=jnp.float32) + b1_ref[...]
    h = jnp.maximum(h, 0.0)
    # Linear 2 -> logits over the lane-padded action axis.  Pad columns carry
    # zero weights and a -1e9 bias, so they contribute ~0 to the softmax sum.
    logits = jnp.dot(h.astype(jnp.bfloat16), w2_ref[...],
                     preferred_element_type=jnp.float32) + b2_ref[...]
    # Numerically-stable log-softmax over the (padded) action axis, f32.
    m = jnp.max(logits, axis=-1, keepdims=True)
    z = logits - m
    logp_ref[...] = z - jnp.log(jnp.sum(jnp.exp(z), axis=-1, keepdims=True))


def _auto_block_b(B, L1, A_pad):
    """Pick the batch tile: full batch (grid=1) for modest B, capped tiles above."""
    Bp = _round_up(B, SUBLANE_BF16)
    if Bp <= 512:
        return Bp
    # VMEM guardrail for rollout-sized batches / real observation sizes:
    # double-buffered f32 input tile + f32 output tile must stay well under the
    # default scoped VMEM limit (conservative for v7x's 64 MiB physical VMEM).
    budget = 24 * 1024 * 1024
    per_row = 2 * (L1 * 4 + A_pad * 4)
    cap = max(SUBLANE_BF16, (budget // per_row) // SUBLANE_BF16 * SUBLANE_BF16)
    return min(512, cap)


@functools.partial(jax.jit, static_argnames=("num_actions", "block_b"))
def actor_log_probs(d_obs, w1, b1, w2p, b2p, *, num_actions, block_b=None):
    """log_softmax(MLP(d_obs)) in one fused Pallas kernel.

    d_obs: (B, L1) float32.  Returns log-probs (B, num_actions) float32.
    w1/w2p are bf16 (w2p/b2p lane-padded to 128 actions), b1/b2p are f32.
    """
    B, L1 = d_obs.shape
    L2, A_pad = w2p.shape

    if block_b is None:
        block_b = _auto_block_b(B, L1, A_pad)
    tb = _round_up(min(block_b, _round_up(B, SUBLANE_BF16)), SUBLANE_BF16)
    Bp = _round_up(B, tb)
    if Bp != B:
        # TODO(synk): for rollout-sized B, supply batch sizes that are already
        # multiples of tb; this pad materializes an extra HBM copy (negligible
        # at small B, real traffic at rollout scale).
        d_obs = jnp.pad(d_obs, ((0, Bp - B), (0, 0)))

    logp = pl.pallas_call(
        _actor_logp_kernel,
        out_shape=jax.ShapeDtypeStruct((Bp, A_pad), jnp.float32),
        grid_spec=pltpu.PrefetchScalarGridSpec(
            num_scalar_prefetch=0,
            grid=(Bp // tb,),
            in_specs=[
                pl.BlockSpec((tb, L1), lambda i: (i, 0)),    # per-block batch slice
                pl.BlockSpec((L1, L2), lambda i: (0, 0)),    # constant index_map =>
                pl.BlockSpec((1, L2), lambda i: (0, 0)),     #   weights/biases stay
                pl.BlockSpec((L2, A_pad), lambda i: (0, 0)), #   VMEM-resident across
                pl.BlockSpec((1, A_pad), lambda i: (0, 0)),  #   the whole grid
            ],
            out_specs=pl.BlockSpec((tb, A_pad), lambda i: (i, 0)),
        ),
        compiler_params=pltpu.CompilerParams(
            dimension_semantics=("parallel",)),  # v7x megacore split when grid > 1
    )(d_obs, w1, b1, w2p, b2p)
    return logp[:B, :num_actions]


@functools.partial(jax.jit, static_argnames=("num_actions", "deterministic"))
def actor_forward_device(d_obs, params, key, *, num_actions, deterministic=False):
    """Actor.forward semantics entirely on device (no host sync).

    Returns (action int32 scalar, action_prob f32 scalar) as device arrays.
    """
    w1, b1, w2p, b2p = params
    # Only row 0 is consumed (as in the PyTorch reference), so feed at most one
    # bf16-sublane's worth of rows through the kernel instead of the whole batch.
    head = d_obs[: min(d_obs.shape[0], SUBLANE_BF16)]
    logp = actor_log_probs(head, w1, b1, w2p, b2p, num_actions=num_actions)
    row0 = logp[0]
    if deterministic:
        action = jnp.argmax(row0).astype(jnp.int32)
        action_prob = jnp.float32(1.0)               # matches reference semantics
    else:
        action = jax.random.categorical(key, row0).astype(jnp.int32)
        action_prob = jnp.exp(row0[action])
    return action, action_prob


def actor_forward(d_obs, params, key, num_actions, deterministic=False):
    """Host-facing wrapper matching the PyTorch API: returns (int, float).
    Forces one device->host sync; prefer actor_forward_device in hot loops."""
    action, action_prob = actor_forward_device(
        d_obs, params, key, num_actions=num_actions, deterministic=deterministic)
    return int(action), float(action_prob)


def init_actor_params(key, layers1_num, layers2_num, out_num):
    """Deterministic init mimicking torch.nn.Linear defaults:
    U(-1/sqrt(fan_in), 1/sqrt(fan_in)) for both weights and biases.
    Weights stored transposed vs PyTorch (x @ W + b), in bf16 for the MXU;
    the action axis of layer 2 is lane-padded to 128 (zero weights, -1e9 bias
    on pad columns so they vanish under softmax)."""
    k1, k2, k3, k4 = jax.random.split(key, 4)
    lim1 = 1.0 / jnp.sqrt(jnp.float32(layers1_num))
    lim2 = 1.0 / jnp.sqrt(jnp.float32(layers2_num))
    w1 = jax.random.uniform(k1, (layers1_num, layers2_num), jnp.float32, -lim1, lim1)
    b1 = jax.random.uniform(k2, (1, layers2_num), jnp.float32, -lim1, lim1)
    w2 = jax.random.uniform(k3, (layers2_num, out_num), jnp.float32, -lim2, lim2)
    b2 = jax.random.uniform(k4, (1, out_num), jnp.float32, -lim2, lim2)

    a_pad = _round_up(out_num, LANE)
    w2p = jnp.zeros((layers2_num, a_pad), jnp.float32).at[:, :out_num].set(w2)
    b2p = jnp.full((1, a_pad), -1e9, jnp.float32).at[:, :out_num].set(b2)
    return (w1.astype(jnp.bfloat16), b1,
            w2p.astype(jnp.bfloat16), b2p)


if __name__ == "__main__":
    # Small, module-consistent shapes: B=128 observations, layers1_num=32,
    # layers2_num=64, out_num=2 (Pong up/down as in ppo_loss).
    B, L1, L2, A = 128, 32, 64, 2

    key = jax.random.PRNGKey(0)
    pkey, xkey, skey = jax.random.split(key, 3)

    params = init_actor_params(pkey, L1, L2, A)
    d_obs = jax.random.normal(xkey, (B, L1), dtype=jnp.float32)

    # Full-batch log-probs: auto block selection -> grid=(1,), single fused kernel.
    logp = actor_log_probs(d_obs, *params, num_actions=A)
    jax.block_until_ready(logp)

    # Device-side forward paths (no host sync inside the jitted functions);
    # these only push 16 rows through the kernel.
    act_det_d, p_det_d = actor_forward_device(
        d_obs, params, skey, num_actions=A, deterministic=True)
    act_sto_d, p_sto_d = actor_forward_device(
        d_obs, params, skey, num_actions=A, deterministic=False)
    jax.block_until_ready((act_det_d, p_det_d, act_sto_d, p_sto_d))

    # Pull to host only for the final sanity checks / PyTorch-API parity.
    act_det, p_det = int(act_det_d), float(p_det_d)
    act_sto, p_sto = int(act_sto_d), float(p_sto_d)

    assert logp.shape == (B, A)
    probs0 = jnp.exp(logp[0])
    assert abs(float(jnp.sum(probs0)) - 1.0) < 1e-5
    assert p_det == 1.0 and 0.0 < p_sto <= 1.0
    assert 0 <= act_det < A and 0 <= act_sto < A

    print("KERNEL_OK")
</pallas_src>

<mosaic_0001>
module attributes {stable_mosaic.version = 11 : i64} {
  func.func @_actor_logp_kernel(%arg0: i32, %arg1: memref<128x32xf32, #tpu.memory_space<vmem>>, %arg2: memref<32x64xbf16, #tpu.memory_space<vmem>>, %arg3: memref<1x64xf32, #tpu.memory_space<vmem>>, %arg4: memref<64x128xbf16, #tpu.memory_space<vmem>>, %arg5: memref<1x128xf32, #tpu.memory_space<vmem>>, %arg6: memref<128x128xf32, #tpu.memory_space<vmem>>) attributes {dimension_semantics = [#tpu.dimension_semantics<parallel>], iteration_bounds = array<i64: 1>, scalar_prefetch = 0 : i64, scratch_operands = 0 : i64, tpu.core_type = #tpu.core_type<tc>, window_params = [{transform_indices = @transform_0, window_bounds = array<i64: 128, 32>}, {pipeline_mode = #tpu.pipeline_mode<synchronous>, transform_indices = @transform_1, window_bounds = array<i64: 32, 64>}, {pipeline_mode = #tpu.pipeline_mode<synchronous>, transform_indices = @transform_2, window_bounds = array<i64: 1, 64>}, {pipeline_mode = #tpu.pipeline_mode<synchronous>, transform_indices = @transform_3, window_bounds = array<i64: 64, 128>}, {pipeline_mode = #tpu.pipeline_mode<synchronous>, transform_indices = @transform_4, window_bounds = array<i64: 1, 128>}, {transform_indices = @transform_5, window_bounds = array<i64: 128, 128>}]} {
    %c0 = arith.constant 0 : index
    %c0_0 = arith.constant 0 : index
    %0 = vector.load %arg1[%c0, %c0_0] : memref<128x32xf32, #tpu.memory_space<vmem>>, vector<128x32xf32>
    %1 = arith.truncf %0 : vector<128x32xf32> to vector<128x32xbf16>
    %c0_1 = arith.constant 0 : index
    %c0_2 = arith.constant 0 : index
    %2 = vector.load %arg2[%c0_1, %c0_2] : memref<32x64xbf16, #tpu.memory_space<vmem>>, vector<32x64xbf16>
    %cst = arith.constant dense<0.000000e+00> : vector<128x64xf32>
    %3 = tpu.matmul %1, %2, %cst {dimension_numbers = #tpu.dot_dimension_numbers<[1], [0], [0], [1], [0, 0, 1, 1], [], []>} : vector<128x32xbf16>, vector<32x64xbf16>, vector<128x64xf32> -> vector<128x64xf32>
    %c0_3 = arith.constant 0 : index
    %c0_4 = arith.constant 0 : index
    %4 = vector.load %arg3[%c0_3, %c0_4] : memref<1x64xf32, #tpu.memory_space<vmem>>, vector<1x64xf32>
    %5 = vector.broadcast %4 : vector<1x64xf32> to vector<128x64xf32>
    %6 = arith.addf %3, %5 : vector<128x64xf32>
    %cst_5 = arith.constant 0.000000e+00 : f32
    %7 = vector.broadcast %cst_5 : f32 to vector<128x64xf32>
    %8 = arith.maximumf %6, %7 : vector<128x64xf32>
    %9 = arith.truncf %8 : vector<128x64xf32> to vector<128x64xbf16>
    %c0_6 = arith.constant 0 : index
    %c0_7 = arith.constant 0 : index
    %10 = vector.load %arg4[%c0_6, %c0_7] : memref<64x128xbf16, #tpu.memory_space<vmem>>, vector<64x128xbf16>
    %cst_8 = arith.constant dense<0.000000e+00> : vector<128x128xf32>
    %11 = tpu.matmul %9, %10, %cst_8 {dimension_numbers = #tpu.dot_dimension_numbers<[1], [0], [0], [1], [0, 0, 1, 1], [], []>} : vector<128x64xbf16>, vector<64x128xbf16>, vector<128x128xf32> -> vector<128x128xf32>
    %c0_9 = arith.constant 0 : index
    %c0_10 = arith.constant 0 : index
    %12 = vector.load %arg5[%c0_9, %c0_10] : memref<1x128xf32, #tpu.memory_space<vmem>>, vector<1x128xf32>
    %13 = vector.broadcast %12 : vector<1x128xf32> to vector<128x128xf32>
    %14 = arith.addf %11, %13 : vector<128x128xf32>
    %cst_11 = arith.constant dense<0xFF800000> : vector<128xf32>
    %15 = vector.multi_reduction <maximumf>, %14, %cst_11 [1] : vector<128x128xf32> to vector<128xf32>
    %16 = vector.shape_cast %15 : vector<128xf32> to vector<128x1xf32>
    %17 = vector.broadcast %16 : vector<128x1xf32> to vector<128x128xf32>
    %18 = arith.subf %14, %17 : vector<128x128xf32>
    %19 = math.exp %18 : vector<128x128xf32>
    %cst_12 = arith.constant dense<0.000000e+00> : vector<128xf32>
    %20 = vector.multi_reduction <add>, %19, %cst_12 [1] : vector<128x128xf32> to vector<128xf32>
    %21 = vector.shape_cast %20 : vector<128xf32> to vector<128x1xf32>
    %22 = math.log %21 : vector<128x1xf32>
    %23 = vector.broadcast %22 : vector<128x1xf32> to vector<128x128xf32>
    %24 = arith.subf %18, %23 : vector<128x128xf32>
    %c0_13 = arith.constant 0 : index
    %c0_14 = arith.constant 0 : index
    %25 = vector.load %arg6[%c0_13, %c0_14] : memref<128x128xf32, #tpu.memory_space<vmem>>, vector<128x128xf32>
    tpu.vector_store %arg6[%c0_13, %c0_14], %24 {strides = array<i32>} : memref<128x128xf32, #tpu.memory_space<vmem>>, vector<128x128xf32>,
    return
  }
  func.func @transform_0(%arg0: i32) -> (i32, i32) {
    %c0_i32 = arith.constant 0 : i32
    %c0_i32_0 = arith.constant 0 : i32
    return %arg0, %c0_i32 : i32, i32
  }
  func.func @transform_1(%arg0: i32) -> (i32, i32) {
    %c0_i32 = arith.constant 0 : i32
    %c0_i32_0 = arith.constant 0 : i32
    %c0_i32_1 = arith.constant 0 : i32
    return %c0_i32, %c0_i32_0 : i32, i32
  }
  func.func @transform_2(%arg0: i32) -> (i32, i32) {
    %c0_i32 = arith.constant 0 : i32
    %c0_i32_0 = arith.constant 0 : i32
    %c0_i32_1 = arith.constant 0 : i32
    return %c0_i32, %c0_i32_0 : i32, i32
  }
  func.func @transform_3(%arg0: i32) -> (i32, i32) {
    %c0_i32 = arith.constant 0 : i32
    %c0_i32_0 = arith.constant 0 : i32
    %c0_i32_1 = arith.constant 0 : i32
    return %c0_i32, %c0_i32_0 : i32, i32
  }
  func.func @transform_4(%arg0: i32) -> (i32, i32) {
    %c0_i32 = arith.constant 0 : i32
    %c0_i32_0 = arith.constant 0 : i32
    %c0_i32_1 = arith.constant 0 : i32
    return %c0_i32, %c0_i32_0 : i32, i32
  }
  func.func @transform_5(%arg0: i32) -> (i32, i32) {
    %c0_i32 = arith.constant 0 : i32
    %c0_i32_0 = arith.constant 0 : i32
    return %arg0, %c0_i32 : i32, i32
  }
}

</mosaic_0001>

<bundles_post_ra>
// kernel: actor_log_probs.1
= control target key start
LH: loop header
LB: loop body
LE: loop exit
PB: predicated region body
PF: predicated region fallthrough
CT: control target
= control target key end

     0   :  { %vm68_vm0 = vcmask 261120   ;;  %vm253_vm1 = vcmask 523264   ;;  %s965_s1 = inlined_call_operand.vmem [shape: bf16[32,64], index: 1, kind: input, shape index: {}]   ;;  %s966_s0 = inlined_call_operand.vmem [shape: f32[128,32], index: 0, kind: input, shape index: {}]   ;;  %s967_s3 = inlined_call_operand.vmem [shape: bf16[64,128], index: 3, kind: input, shape index: {}]   ;;  %s968_s2 = inlined_call_operand.vmem [shape: f32[1,64], index: 2, kind: input, shape index: {}]   ;;  %s969_s4 = inlined_call_operand.vmem [shape: f32[1,128], index: 4, kind: input, shape index: {}]   ;;  %s970_s5 = inlined_call_operand.vmem [shape: f32[128,128], index: 5, kind: output, shape index: {}]  }
   0x1   :  { %v645_v0 = vld [vmem:[%s965_s1] sm:$0xff]   ;;  %v646_v1 = vld [vmem:[%s965_s1 + $0x8] sm:$0xff]   ;;  %v23_v5 = vld [vmem:[%s966_s0 + $0x10] sm:$0xff] }
   0x2   :  { %601 = vmatprep.subr.bf16.mxu0 %v645_v0  ;;  %v21_v2 = vld [vmem:[%s966_s0] sm:$0xff]  ;;  %v22_v3 = vld [vmem:[%s966_s0 + $0x8] sm:$0xff]  ;;  %v24_v6 = vld [vmem:[%s966_s0 + $0x18] sm:$0xff] }
   0x3   :  { %602 = vmatpush3.bf16.msra.mxu0 %v645_v0  ;;  %v37_v4 = vpack.c.bf16 %v22_v3, %v21_v2  ;;  %v25_v7 = vld [vmem:[%s966_s0 + $0x20] sm:$0xff]  ;;  %v26_v8 = vld [vmem:[%s966_s0 + $0x28] sm:$0xff]  ;;  %v38_v9 = vpack.c.bf16 %v24_v6, %v23_v5  ;;  %v27_v13 = vld [vmem:[%s966_s0 + $0x30] sm:$0xff] }
   0x4   :  { %603 = vmatprep.subr.bf16.mxu0 %v646_v1  ;;  %v39_v10 = vpack.c.bf16 %v26_v8, %v25_v7  ;;  %v647_v11 = vld [vmem:[%s967_s3] sm:$0xff]   ;;  %v648_v12 = vld [vmem:[%s967_s3 + $0x8] sm:$0xff]   ;;  %v28_v14 = vld [vmem:[%s966_s0 + $0x38] sm:$0xff] }
   0x5   :  { %605 = vmatprep.mubr.msk.bf16.mxu0 %vm68_vm0, %v37_v4  ;;  %621 = vmatprep.subr.bf16.mxu1 %v647_v11  ;;  %v29_v15 = vld [vmem:[%s966_s0 + $0x40] sm:$0xff]  ;;  %v30_v16 = vld [vmem:[%s966_s0 + $0x48] sm:$0xff]  ;;  %v40_v17 = vpack.c.bf16 %v28_v14, %v27_v13  ;;  %v31_v19 = vld [vmem:[%s966_s0 + $0x50] sm:$0xff] }
   0x6   :  { %622 = vmatpush3.bf16.msra.mxu1 %v647_v11  ;;  %v41_v18 = vpack.c.bf16 %v30_v16, %v29_v15  ;;  %v32_v20 = vld [vmem:[%s966_s0 + $0x58] sm:$0xff]  ;;  %v33_v21 = vld [vmem:[%s966_s0 + $0x60] sm:$0xff]  ;;  %v34_v22 = vld [vmem:[%s966_s0 + $0x68] sm:$0xff] }
   0x7   :  { %604 = vmatpush3.bf16.msra.mxu0 %v646_v1  ;;  %623 = vmatprep.subr.bf16.mxu1 %v648_v12  ;;  %v42_v23 = vpack.c.bf16 %v32_v20, %v31_v19  ;;  %v43_v24 = vpack.c.bf16 %v34_v22, %v33_v21  ;;  %v35_v25 = vld [vmem:[%s966_s0 + $0x70] sm:$0xff]  ;;  %v36_v26 = vld [vmem:[%s966_s0 + $0x78] sm:$0xff]  ;;  %v555_v30 = vld [vmem:[%s968_s2] ss:$0 sm:$0xff] }
   0x8   :  { %v44_v27 = vpack.c.bf16 %v36_v26, %v35_v25  ;;  %v649_v28 = vld [vmem:[%s967_s3 + $0x10] sm:$0xff]   ;;  %v650_v29 = vld [vmem:[%s967_s3 + $0x18] sm:$0xff]  }
   0xa   :  { %606 = vmatmul.mubr.msk.bf16.vlgmr.msra.gmra.mrb[0].mxu0 %vm68_vm0, %v38_v9  ;;  %624 = vmatpush3.bf16.msra.mxu1 %v648_v12 }
   0xb   :  { %609 = vmatprep.mubr.msk.bf16.mxu0 %vm68_vm0, %v39_v10  ;;  %625 = vmatprep.subr.bf16.mxu1 %v649_v28 }
   0xe   :  { %626 = vmatpush3.bf16.msra.mxu1 %v649_v28 }
   0xf   :  { %627 = vmatprep.subr.bf16.mxu1 %v650_v29 }
  0x12   :  { %610 = vmatmul.mubr.msk.bf16.gmra.mrb[4].mxu0 %vm68_vm0, %v40_v17  ;;  %628 = vmatpush3.bf16.msra.mxu1 %v650_v29 }
  0x13   :  { %613 = vmatprep.mubr.msk.bf16.mxu0 %vm68_vm0, %v41_v18 }
  0x1a   :  { %614 = vmatmul.mubr.msk.bf16.gmra.mrb[8].mxu0 %vm68_vm0, %v42_v23  ;;  %v566_v23 = vld [vmem:[%s969_s4] ss:$0 sm:$0xff] }
  0x1b   :  { %617 = vmatprep.mubr.msk.bf16.mxu0 %vm68_vm0, %v43_v24 }
  0x22   :  { %618 = vmatmul.mubr.msk.bf16.gmra.mrb[12].mxu0 %vm68_vm0, %v44_v27 }
  0xdd   :  { %v607_v31 = vpop.f32.mrb[0].mxu0 }
  0xde   :  { %v136_v32 = vadd.f32 %v607_v31, %v555_v30  ;;  %v127_v33 = vpop.f32.mrb[1].mxu0 }
  0xdf   :  { %v128_v34 = vadd.f32 %v555_v30, %v127_v33  ;;  %v608_v35 = vpop.f32.mrb[2].mxu0 }
  0xe0   :  { %v139_v36 = vadd.f32 %v608_v35, %v555_v30  ;;  %v130_v37 = vpop.f32.mrb[3].mxu0  ;;  %v192_v39 = vmax.f32 %v136_v32, 0.0 }
  0xe1   :  { %v131_v38 = vadd.f32 %v555_v30, %v130_v37  ;;  %v190_v41 = vmax.f32 %v128_v34, 0.0 }
  0xe2   :  { %v193_v40 = vmax.f32 %v139_v36, 0.0 }
  0xe3   :  { %v191_v42 = vmax.f32 %v131_v38, 0.0 }
  0xe4   :  { %v207_v43 = vpack.c.bf16 %v193_v40, %v192_v39 }
  0xe5   :  { %v611_v44 = vpop.f32.mrb[4].mxu0  ;;  %v206_v45 = vpack.c.bf16 %v191_v42, %v190_v41 }
  0xe6   :  { %v152_v46 = vadd.f32 %v611_v44, %v555_v30  ;;  %v143_v47 = vpop.f32.mrb[5].mxu0 }
  0xe7   :  { %v144_v48 = vadd.f32 %v555_v30, %v143_v47  ;;  %v612_v49 = vpop.f32.mrb[6].mxu0  ;;  %629 = vmatprep.mubr.msk.bf16.mxu1 %vm253_vm1, %v206_v45 }
  0xe8   :  { %v196_v50 = vmax.f32 %v152_v46, 0.0  ;;  %v155_v51 = vadd.f32 %v612_v49, %v555_v30  ;;  %v146_v52 = vpop.f32.mrb[7].mxu0  ;;  %630 = vmatmul.mubr.msk.bf16.vlgmr.msra.gmra.mrb[0].mxu1 %vm253_vm1, %v207_v43 }
  0xe9   :  { %v147_v53 = vadd.f32 %v555_v30, %v146_v52  ;;  %v194_v55 = vmax.f32 %v144_v48, 0.0 }
  0xea   :  { %v197_v54 = vmax.f32 %v155_v51, 0.0 }
  0xeb   :  { %v195_v56 = vmax.f32 %v147_v53, 0.0 }
  0xec   :  { %v209_v57 = vpack.c.bf16 %v197_v54, %v196_v50 }
  0xed   :  { %v208_v58 = vpack.c.bf16 %v195_v56, %v194_v55  ;;  %v615_v59 = vpop.f32.mrb[8].mxu0 }
  0xee   :  { %v168_v60 = vadd.f32 %v615_v59, %v555_v30  ;;  %v159_v61 = vpop.f32.mrb[9].mxu0 }
  0xef   :  { %v160_v62 = vadd.f32 %v555_v30, %v159_v61  ;;  %v616_v63 = vpop.f32.mrb[10].mxu0  ;;  %633 = vmatprep.mubr.msk.bf16.mxu1 %vm253_vm1, %v208_v58 }
  0xf0   :  { %v200_v0 = vmax.f32 %v168_v60, 0.0  ;;  %v171_v1 = vadd.f32 %v616_v63, %v555_v30  ;;  %v162_v2 = vpop.f32.mrb[11].mxu0  ;;  %634 = vmatmul.mubr.msk.bf16.gmra.mrb[4].mxu1 %vm253_vm1, %v209_v57 }
  0xf1   :  { %v163_v3 = vadd.f32 %v555_v30, %v162_v2  ;;  %v198_v5 = vmax.f32 %v160_v62, 0.0 }
  0xf2   :  { %v201_v4 = vmax.f32 %v171_v1, 0.0 }
  0xf3   :  { %v199_v6 = vmax.f32 %v163_v3, 0.0 }
  0xf4   :  { %v211_v7 = vpack.c.bf16 %v201_v4, %v200_v0 }
  0xf5   :  { %v210_v8 = vpack.c.bf16 %v199_v6, %v198_v5  ;;  %v619_v9 = vpop.f32.mrb[12].mxu0 }
  0xf6   :  { %v184_v10 = vadd.f32 %v619_v9, %v555_v30  ;;  %v175_v11 = vpop.f32.mrb[13].mxu0 }
  0xf7   :  { %v176_v12 = vadd.f32 %v555_v30, %v175_v11  ;;  %v620_v13 = vpop.f32.mrb[14].mxu0  ;;  %637 = vmatprep.mubr.msk.bf16.mxu1 %vm253_vm1, %v210_v8 }
  0xf8   :  { %v204_v14 = vmax.f32 %v184_v10, 0.0  ;;  %v187_v15 = vadd.f32 %v620_v13, %v555_v30  ;;  %v178_v16 = vpop.f32.mrb[15].mxu0  ;;  %638 = vmatmul.mubr.msk.bf16.gmra.mrb[8].mxu1 %vm253_vm1, %v211_v7 }
  0xf9   :  { %v179_v17 = vadd.f32 %v555_v30, %v178_v16  ;;  %v202_v19 = vmax.f32 %v176_v12, 0.0 }
  0xfa   :  { %v205_v18 = vmax.f32 %v187_v15, 0.0 }
  0xfb   :  { %v203_v20 = vmax.f32 %v179_v17, 0.0 }
  0xfc   :  { %v213_v21 = vpack.c.bf16 %v205_v18, %v204_v14 }
  0xfd   :  { %v212_v22 = vpack.c.bf16 %v203_v20, %v202_v19 }
  0xff   :  { %641 = vmatprep.mubr.msk.bf16.mxu1 %vm253_vm1, %v212_v22 }
 0x100   :  { %642 = vmatmul.mubr.msk.bf16.gmra.mrb[12].mxu1 %vm253_vm1, %v213_v21 }
 0x1bb   :  { %v631_v24 = vpop.f32.mrb[0].mxu1 }
 0x1bc   :  { %v321_v25 = vadd.f32 %v631_v24, %v566_v23  ;;  %v312_v26 = vpop.f32.mrb[1].mxu1 }
 0x1bd   :  { %v313_v27 = vadd.f32 %v566_v23, %v312_v26  ;;  %v632_v28 = vpop.f32.mrb[2].mxu1 }
 0x1be   :  { %379 = vmax.xlane.f32.xlu1 %v321_v25  ;;  %v315_v29 = vpop.f32.mrb[3].mxu1  ;;  %v324_v30 = vadd.f32 %v632_v28, %v566_v23 }
 0x1bf   :  { %375 = vmax.xlane.f32.xlu0 %v313_v27  ;;  %v316_v31 = vadd.f32 %v566_v23, %v315_v29 }
 0x1c2   :  { %381 = vmax.xlane.f32.xlu1 %v324_v30 }
 0x1c3   :  { %v635_v32 = vpop.f32.mrb[4].mxu1  ;;  %377 = vmax.xlane.f32.xlu0 %v316_v31 }
 0x1c4   :  { %v337_v33 = vadd.f32 %v635_v32, %v566_v23  ;;  %v328_v34 = vpop.f32.mrb[5].mxu1 }
 0x1c5   :  { %v636_v35 = vpop.f32.mrb[6].mxu1  ;;  %v329_v38 = vadd.f32 %v566_v23, %v328_v34 }
 0x1c6   :  { %v340_v36 = vadd.f32 %v636_v35, %v566_v23  ;;  %v331_v37 = vpop.f32.mrb[7].mxu1 }
 0x1c7   :  { %387 = vmax.xlane.f32.xlu0 %v337_v33  ;;  %v332_v39 = vadd.f32 %v566_v23, %v331_v37 }
 0x1c8   :  { %389 = vmax.xlane.f32.xlu1 %v340_v36 }
 0x1cb   :  { %v639_v40 = vpop.f32.mrb[8].mxu1  ;;  %383 = vmax.xlane.f32.xlu0 %v329_v38 }
 0x1cc   :  { %v353_v41 = vadd.f32 %v639_v40, %v566_v23  ;;  %v344_v42 = vpop.f32.mrb[9].mxu1  ;;  %385 = vmax.xlane.f32.xlu1 %v332_v39 }
 0x1cd   :  { %v640_v43 = vpop.f32.mrb[10].mxu1  ;;  %v345_v46 = vadd.f32 %v566_v23, %v344_v42 }
 0x1ce   :  { %v356_v44 = vadd.f32 %v640_v43, %v566_v23  ;;  %v347_v45 = vpop.f32.mrb[11].mxu1 }
 0x1cf   :  { %395 = vmax.xlane.f32.xlu0 %v353_v41  ;;  %v833_v47 = vadd.f32 %v566_v23, %v347_v45 }
 0x1d0   :  { %397 = vmax.xlane.f32.xlu1 %v356_v44 }
 0x1d3   :  { %v643_v48 = vpop.f32.mrb[12].mxu1  ;;  %391 = vmax.xlane.f32.xlu0 %v345_v46 }
 0x1d4   :  { %v360_v49 = vpop.f32.mrb[13].mxu1  ;;  %393 = vmax.xlane.f32.xlu1 %v833_v47  ;;  %v841_v54 = vadd.f32 %v643_v48, %v566_v23 }
 0x1d5   :  { %v836_v50 = vadd.f32 %v566_v23, %v360_v49  ;;  %v644_v51 = vpop.f32.mrb[14].mxu1 }
 0x1d6   :  { %v363_v52 = vpop.f32.mrb[15].mxu1  ;;  %v844_v55 = vadd.f32 %v644_v51, %v566_v23 }
 0x1d7   :  { %v838_v53 = vadd.f32 %v566_v23, %v363_v52  ;;  %399 = vmax.xlane.f32.xlu0 %v836_v50 }
 0x1d9   :  { %401 = vmax.xlane.f32.xlu1 %v838_v53 }
 0x1db   :  { %403 = vmax.xlane.f32.xlu0 %v841_v54 }
 0x1dd   :  { %405 = vmax.xlane.f32.xlu1 %v844_v55 }
 0x24b   :  { %v380_v56 = vpop.xlane.xlu1 %379 }
 0x24c   :  { %v848_v57 = vsub.f32 %v321_v25, %v380_v56  ;;  %v376_v58 = vpop.xlane.xlu0 %375 }
 0x24d   :  { %v850_v59 = vsub.f32 %v313_v27, %v376_v58 }
 0x24e   :  { %v427_v60 = vmul.f32 1.442695, %v848_v57 }
 0x24f   :  { %v423_v61 = vmul.f32 1.442695, %v850_v59  ;;  %v382_v62 = vpop.xlane.xlu1 %381 }
 0x250   :  { %651 = vpow2.f32 %v427_v60  ;;  %v854_v63 = vsub.f32 %v324_v30, %v382_v62  ;;  %v378_v0 = vpop.xlane.xlu0 %377 }
 0x251   :  { %v856_v1 = vsub.f32 %v316_v31, %v378_v0  ;;  %653 = vpow2.f32 %v423_v61 }
 0x252   :  { %v429_v2 = vmul.f32 1.442695, %v854_v63 }
 0x253   :  { %v425_v3 = vmul.f32 1.442695, %v856_v1 }
 0x254   :  { %655 = vpow2.f32 %v429_v2  ;;  %v388_v4 = vpop.xlane.xlu0 %387 }
 0x255   :  { %v860_v5 = vsub.f32 %v337_v33, %v388_v4  ;;  %v390_v6 = vpop.xlane.xlu1 %389  ;;  %657 = vpow2.f32 %v425_v3 }
 0x256   :  { %v862_v7 = vsub.f32 %v340_v36, %v390_v6 }
 0x257   :  { %v435_v8 = vmul.f32 1.442695, %v860_v5 }
 0x258   :  { %v437_v9 = vmul.f32 1.442695, %v862_v7  ;;  %v384_v10 = vpop.xlane.xlu0 %383 }
 0x259   :  { %659 = vpow2.f32 %v435_v8  ;;  %v866_v11 = vsub.f32 %v329_v38, %v384_v10  ;;  %v386_v12 = vpop.xlane.xlu1 %385 }
 0x25a   :  { %v652_v13 = vpop.eup %651  ;;  %v868_v14 = vsub.f32 %v332_v39, %v386_v12  ;;  %661 = vpow2.f32 %v437_v9 }
 0x25b   :  { %v431_v15 = vmul.f32 1.442695, %v866_v11  ;;  %459 = vadd.xlane.f32.xlu0 %v652_v13  ;;  %v654_v18 = vpop.eup %653 }
 0x25c   :  { %v433_v16 = vmul.f32 1.442695, %v868_v14  ;;  %v396_v17 = vpop.xlane.xlu0 %395 }
 0x25d   :  { %663 = vpow2.f32 %v431_v15  ;;  %v872_v19 = vsub.f32 %v353_v41, %v396_v17  ;;  %v398_v20 = vpop.xlane.xlu1 %397 }
 0x25e   :  { %v656_v21 = vpop.eup %655  ;;  %v874_v22 = vsub.f32 %v356_v44, %v398_v20  ;;  %665 = vpow2.f32 %v433_v16 }
 0x25f   :  { %v443_v23 = vmul.f32 1.442695, %v872_v19  ;;  %461 = vadd.xlane.f32.xlu1 %v656_v21  ;;  %455 = vadd.xlane.f32.xlu0 %v654_v18  ;;  %v658_v28 = vpop.eup %657 }
 0x260   :  { %v445_v24 = vmul.f32 1.442695, %v874_v22  ;;  %v392_v25 = vpop.xlane.xlu0 %391 }
 0x261   :  { %667 = vpow2.f32 %v443_v23  ;;  %v878_v26 = vsub.f32 %v345_v46, %v392_v25  ;;  %v394_v27 = vpop.xlane.xlu1 %393 }
 0x262   :  { %v881_v29 = vsub.f32 %v833_v47, %v394_v27  ;;  %669 = vpow2.f32 %v445_v24 }
 0x263   :  { %v660_v30 = vpop.eup %659  ;;  %v439_v31 = vmul.f32 1.442695, %v878_v26  ;;  %457 = vadd.xlane.f32.xlu1 %v658_v28 }
 0x264   :  { %v441_v32 = vmul.f32 1.442695, %v881_v29  ;;  %467 = vadd.xlane.f32.xlu0 %v660_v30  ;;  %v400_v33 = vpop.xlane.xlu0 %399  ;;  %v662_v35 = vpop.eup %661 }
 0x265   :  { %671 = vpow2.f32 %v439_v31  ;;  %v886_v34 = vsub.f32 %v836_v50, %v400_v33 }
 0x266   :  { %v402_v36 = vpop.xlane.xlu1 %401  ;;  %673 = vpow2.f32 %v441_v32 }
 0x267   :  { %v664_v37 = vpop.eup %663  ;;  %v447_v38 = vmul.f32 1.442695, %v886_v34  ;;  %v890_v39 = vsub.f32 %v838_v53, %v402_v36  ;;  %469 = vadd.xlane.f32.xlu1 %v662_v35 }
 0x268   :  { %463 = vadd.xlane.f32.xlu0 %v664_v37  ;;  %v404_v40 = vpop.xlane.xlu0 %403  ;;  %v666_v43 = vpop.eup %665 }
 0x269   :  { %675 = vpow2.f32 %v447_v38  ;;  %v449_v41 = vmul.f32 1.442695, %v890_v39  ;;  %v894_v42 = vsub.f32 %v841_v54, %v404_v40 }
 0x26a   :  { %v406_v44 = vpop.xlane.xlu1 %405 }
 0x26b   :  { %v668_v45 = vpop.eup %667  ;;  %677 = vpow2.f32 %v449_v41  ;;  %v451_v46 = vmul.f32 1.442695, %v894_v42  ;;  %v898_v47 = vsub.f32 %v844_v55, %v406_v44  ;;  %465 = vadd.xlane.f32.xlu1 %v666_v43 }
 0x26c   :  { %475 = vadd.xlane.f32.xlu0 %v668_v45  ;;  %v670_v49 = vpop.eup %669 }
 0x26d   :  { %679 = vpow2.f32 %v451_v46  ;;  %v453_v48 = vmul.f32 1.442695, %v898_v47 }
 0x26f   :  { %v672_v50 = vpop.eup %671  ;;  %681 = vpow2.f32 %v453_v48  ;;  %477 = vadd.xlane.f32.xlu1 %v670_v49 }
 0x270   :  { %471 = vadd.xlane.f32.xlu0 %v672_v50  ;;  %v674_v51 = vpop.eup %673 }
 0x273   :  { %v676_v52 = vpop.eup %675  ;;  %473 = vadd.xlane.f32.xlu1 %v674_v51 }
 0x274   :  { %479 = vadd.xlane.f32.xlu0 %v676_v52 }
 0x275   :  { %v678_v53 = vpop.eup %677 }
 0x277   :  { %v680_v54 = vpop.eup %679  ;;  %481 = vadd.xlane.f32.xlu1 %v678_v53 }
 0x278   :  { %483 = vadd.xlane.f32.xlu0 %v680_v54 }
 0x279   :  { %v682_v55 = vpop.eup %681 }
 0x27b   :  { %485 = vadd.xlane.f32.xlu1 %v682_v55 }
 0x2e8   :  { %v460_v56 = vpop.xlane.xlu0 %459 }
 0x2e9   :  { %683 = vlog2.f32 %v460_v56 }
 0x2ec   :  { %v462_v58 = vpop.xlane.xlu1 %461  ;;  %v456_v60 = vpop.xlane.xlu0 %455 }
 0x2ed   :  { %685 = vlog2.f32 %v462_v58 }
 0x2ee   :  { %687 = vlog2.f32 %v456_v60 }
 0x2f0   :  { %v458_v61 = vpop.xlane.xlu1 %457 }
 0x2f1   :  { %689 = vlog2.f32 %v458_v61  ;;  %v468_v62 = vpop.xlane.xlu0 %467 }
 0x2f2   :  { %691 = vlog2.f32 %v468_v62 }
 0x2f3   :  { %v684_v0 = vpop.eup %683 }
 0x2f4   :  { %v492_v2 = vmul.f32 0.6931472, %v684_v0  ;;  %v470_v3 = vpop.xlane.xlu1 %469 }
 0x2f5   :  { %693 = vlog2.f32 %v470_v3  ;;  %v464_v4 = vpop.xlane.xlu0 %463 }
 0x2f6   :  { %v521_v6 = vsub.f32 %v848_v57, %v492_v2  ;;  %695 = vlog2.f32 %v464_v4 }
 0x2f7   :  { %v686_v8 = vpop.eup %685 }
 0x2f8   :  { %v688_v9 = vpop.eup %687  ;;  %537 = vst [vmem:[%s970_s5 + $0x10] sm:$0xff] %v521_v6  ;;  %v494_v10 = vmul.f32 0.6931472, %v686_v8  ;;  %v466_v12 = vpop.xlane.xlu1 %465 }
 0x2f9   :  { %v488_v13 = vmul.f32 0.6931472, %v688_v9  ;;  %697 = vlog2.f32 %v466_v12  ;;  %v476_v15 = vpop.xlane.xlu0 %475 }
 0x2fa   :  { %v522_v16 = vsub.f32 %v854_v63, %v494_v10  ;;  %699 = vlog2.f32 %v476_v15 }
 0x2fb   :  { %v690_v17 = vpop.eup %689  ;;  %v519_v18 = vsub.f32 %v850_v59, %v488_v13 }
 0x2fc   :  { %v692_v20 = vpop.eup %691  ;;  %538 = vst [vmem:[%s970_s5 + $0x18] sm:$0xff] %v522_v16  ;;  %v490_v57 = vmul.f32 0.6931472, %v690_v17  ;;  %v478_v21 = vpop.xlane.xlu1 %477 }
 0x2fd   :  { %535 = vst [vmem:[%s970_s5] sm:$0xff] %v519_v18  ;;  %v500_v23 = vmul.f32 0.6931472, %v692_v20  ;;  %701 = vlog2.f32 %v478_v21  ;;  %v472_v24 = vpop.xlane.xlu0 %471 }
 0x2fe   :  { %v520_v63 = vsub.f32 %v856_v1, %v490_v57  ;;  %703 = vlog2.f32 %v472_v24 }
 0x2ff   :  { %v694_v25 = vpop.eup %693  ;;  %v525_v59 = vsub.f32 %v860_v5, %v500_v23 }
 0x300   :  { %v696_v27 = vpop.eup %695  ;;  %536 = vst [vmem:[%s970_s5 + $0x8] sm:$0xff] %v520_v63  ;;  %v502_v28 = vmul.f32 0.6931472, %v694_v25  ;;  %v474_v30 = vpop.xlane.xlu1 %473 }
 0x301   :  { %541 = vst [vmem:[%s970_s5 + $0x30] sm:$0xff] %v525_v59  ;;  %v496_v31 = vmul.f32 0.6931472, %v696_v27  ;;  %705 = vlog2.f32 %v474_v30  ;;  %v480_v32 = vpop.xlane.xlu0 %479 }
 0x302   :  { %v526_v1 = vsub.f32 %v862_v7, %v502_v28  ;;  %707 = vlog2.f32 %v480_v32 }
 0x303   :  { %v698_v33 = vpop.eup %697  ;;  %v523_v5 = vsub.f32 %v866_v11, %v496_v31 }
 0x304   :  { %v700_v35 = vpop.eup %699  ;;  %542 = vst [vmem:[%s970_s5 + $0x38] sm:$0xff] %v526_v1  ;;  %v498_v36 = vmul.f32 0.6931472, %v698_v33  ;;  %v482_v37 = vpop.xlane.xlu1 %481 }
 0x305   :  { %539 = vst [vmem:[%s970_s5 + $0x20] sm:$0xff] %v523_v5  ;;  %v508_v38 = vmul.f32 0.6931472, %v700_v35  ;;  %709 = vlog2.f32 %v482_v37  ;;  %v484_v40 = vpop.xlane.xlu0 %483 }
 0x306   :  { %v524_v7 = vsub.f32 %v868_v14, %v498_v36  ;;  %711 = vlog2.f32 %v484_v40 }
 0x307   :  { %v702_v41 = vpop.eup %701  ;;  %v529_v11 = vsub.f32 %v872_v19, %v508_v38 }
 0x308   :  { %v704_v43 = vpop.eup %703  ;;  %540 = vst [vmem:[%s970_s5 + $0x28] sm:$0xff] %v524_v7  ;;  %v510_v44 = vmul.f32 0.6931472, %v702_v41  ;;  %v486_v45 = vpop.xlane.xlu1 %485 }
 0x309   :  { %545 = vst [vmem:[%s970_s5 + $0x50] sm:$0xff] %v529_v11  ;;  %v504_v46 = vmul.f32 0.6931472, %v704_v43  ;;  %713 = vlog2.f32 %v486_v45 }
 0x30a   :  { %v530_v48 = vsub.f32 %v874_v22, %v510_v44 }
 0x30b   :  { %v706_v14 = vpop.eup %705  ;;  %v527_v49 = vsub.f32 %v878_v26, %v504_v46 }
 0x30c   :  { %v708_v50 = vpop.eup %707  ;;  %546 = vst [vmem:[%s970_s5 + $0x58] sm:$0xff] %v530_v48  ;;  %v506_v19 = vmul.f32 0.6931472, %v706_v14 }
 0x30d   :  { %543 = vst [vmem:[%s970_s5 + $0x40] sm:$0xff] %v527_v49  ;;  %v512_v51 = vmul.f32 0.6931472, %v708_v50 }
 0x30e   :  { %v528_v52 = vsub.f32 %v881_v29, %v506_v19 }
 0x30f   :  { %v710_v53 = vpop.eup %709  ;;  %v531_v54 = vsub.f32 %v886_v34, %v512_v51 }
 0x310   :  { %v712_v22 = vpop.eup %711  ;;  %544 = vst [vmem:[%s970_s5 + $0x48] sm:$0xff] %v528_v52  ;;  %v514_v26 = vmul.f32 0.6931472, %v710_v53 }
 0x311   :  { %547 = vst [vmem:[%s970_s5 + $0x60] sm:$0xff] %v531_v54  ;;  %v516_v55 = vmul.f32 0.6931472, %v712_v22 }
 0x312   :  { %v532_v56 = vsub.f32 %v890_v39, %v514_v26 }
 0x313   :  { %v714_v58 = vpop.eup %713  ;;  %v533_v60 = vsub.f32 %v894_v42, %v516_v55 }
 0x314   :  { %548 = vst [vmem:[%s970_s5 + $0x68] sm:$0xff] %v532_v56  ;;  %v518_v29 = vmul.f32 0.6931472, %v714_v58 }
 0x315   :  { %549 = vst [vmem:[%s970_s5 + $0x70] sm:$0xff] %v533_v60 }
 0x316   :  { %v534_v34 = vsub.f32 %v898_v47, %v518_v29 }
 0x318   :  { %550 = vst [vmem:[%s970_s5 + $0x78] sm:$0xff] %v534_v34 }

</bundles_post_ra>
